<compile_context>
chip_gen: v6e
topology: v6e:2x2x1
jax: 0.10.0
libtpu: 0.0.40
codegen_flags: <defaults>
</compile_context>

<pallas_src>
import jax
import jax.numpy as jnp
from jax.experimental import pallas as pl
from jax.experimental.pallas import tpu as pltpu


# ---- packed-parameter slab layout: (80, 16) f32, feature-major, 8-row aligned ----
_LANES = 16
_W1_OFF, _B1_OFF = 0, 16     # w1ᵀ: rows 0-15 (cols 0-1),  b1: rows 16-31 (col 0)
_W2_OFF, _B2_OFF = 32, 48    # w2ᵀ: rows 32-47,            b2: rows 48-63 (col 0)
_W3_OFF, _B3_OFF = 64, 72    # w3ᵀ: rows 64-71 (rows 3-7 zero), b3: rows 72-79 (col 0)
_SLAB_ROWS = 80
_OUT_ROWS = 8                # padded output features (3 real + 5 zero rows)


def _round_up(n, m):
    return ((n + m - 1) // m) * m


def mlp_kernel(x_ref, p_ref, o_ref):
    x = x_ref[...]                                   # (2, tb) f32

    # Layer 1: Linear(2, 16) + ReLU on the VPU (K=2 -> two outer-product FMAs).
    w1t = p_ref[_W1_OFF:_W1_OFF + 16, 0:2]           # (16, 2)
    b1 = p_ref[_B1_OFF:_B1_OFF + 16, 0:1]            # (16, 1)
    h1 = w1t[:, 0:1] * x[0:1, :] + w1t[:, 1:2] * x[1:2, :] + b1
    h1 = jnp.maximum(h1, 0.0)                        # (16, tb)

    # Layer 2: Linear(16, 16) + ReLU (MXU: stationary (16,16) LHS, lane-dense RHS).
    w2t = p_ref[_W2_OFF:_W2_OFF + 16, :]             # (16, 16)
    b2 = p_ref[_B2_OFF:_B2_OFF + 16, 0:1]            # (16, 1)
    h2 = jnp.dot(w2t, h1, preferred_element_type=jnp.float32) + b2
    h2 = jnp.maximum(h2, 0.0)                        # (16, tb)

    # Layer 3: Linear(16, 3); w3ᵀ/b3 are zero-padded to 8 output rows so the
    # store block stays sublane-aligned and lane-dense.
    w3t = p_ref[_W3_OFF:_W3_OFF + _OUT_ROWS, :]      # (8, 16), rows 3..7 zero
    b3 = p_ref[_B3_OFF:_B3_OFF + _OUT_ROWS, 0:1]     # (8, 1),  rows 3..7 zero
    h3 = jnp.dot(w3t, h2, preferred_element_type=jnp.float32) + b3

    o_ref[...] = h3.astype(o_ref.dtype)              # (8, tb), lane-dense store


def pack_params(params):
    """Pack w1,b1,w2,b2,w3,b3 into a single feature-major (80, 16) f32 slab.

    params store weights as (in_features, out_features) and biases as
    (1, out_features); they are transposed into feature-major form here.
    """
    slab = jnp.zeros((_SLAB_ROWS, _LANES), jnp.float32)
    slab = slab.at[_W1_OFF:_W1_OFF + 16, 0:2].set(params["w1"].T)       # (16, 2)
    slab = slab.at[_B1_OFF:_B1_OFF + 16, 0:1].set(params["b1"].T)       # (16, 1)
    slab = slab.at[_W2_OFF:_W2_OFF + 16, 0:16].set(params["w2"].T)      # (16, 16)
    slab = slab.at[_B2_OFF:_B2_OFF + 16, 0:1].set(params["b2"].T)       # (16, 1)
    slab = slab.at[_W3_OFF:_W3_OFF + 3, 0:16].set(params["w3"].T)       # (3, 16)
    slab = slab.at[_B3_OFF:_B3_OFF + 3, 0:1].set(params["b3"].T)        # (3, 1)
    return slab


def network_forward(x, slab, *, max_block_cols=8192):
    """x: (B, 2) float32 observations. slab: packed params from pack_params().

    Returns (B, 3) Q-values, identical to the PyTorch Network.forward.
    """
    B, in_dim = x.shape
    assert in_dim == 2, in_dim
    assert max_block_cols % 128 == 0, max_block_cols

    # Batch tile on the lane axis: multiple of 128, and at least 2 grid steps
    # for large B so v7x's two TensorCores can both work ("parallel" axis).
    tb = min(max_block_cols, _round_up(-(-B // 2), 128))
    b_pad = _round_up(B, tb)

    # Feature-major layout plumbing: (B, 2) -> (2, b_pad).  The transpose and
    # the tail pad fuse into one pass over x in XLA.
    x_t = x.T
    if b_pad != B:
        x_t = jnp.pad(x_t, ((0, 0), (0, b_pad - B)))

    out = pl.pallas_call(
        mlp_kernel,
        out_shape=jax.ShapeDtypeStruct((_OUT_ROWS, b_pad), jnp.float32),
        grid=(b_pad // tb,),
        in_specs=[
            pl.BlockSpec((2, tb), lambda i: (0, i)),
            # Constant index_map -> slab DMA'd once, stays VMEM-resident.
            pl.BlockSpec((_SLAB_ROWS, _LANES), lambda i: (0, 0)),
        ],
        out_specs=pl.BlockSpec((_OUT_ROWS, tb), lambda i: (0, i)),
        compiler_params=pltpu.CompilerParams(
            dimension_semantics=("parallel",)),
    )(x_t, slab)

    # (8, b_pad) -> (B, 3): drop zero-padded rows/cols, back to batch-major.
    return out[:3, :B].T


def init_params(key):
    """PyTorch nn.Linear default init (U[-1/sqrt(fan_in), +1/sqrt(fan_in)]).
    Weights are stored as (in_features, out_features)."""
    dims = [(2, 16), (16, 16), (16, 3)]
    params = {}
    for i, (fan_in, fan_out) in enumerate(dims, start=1):
        key, kw, kb = jax.random.split(key, 3)
        bound = 1.0 / jnp.sqrt(float(fan_in))
        params[f"w{i}"] = jax.random.uniform(
            kw, (fan_in, fan_out), jnp.float32, minval=-bound, maxval=bound)
        params[f"b{i}"] = jax.random.uniform(
            kb, (1, fan_out), jnp.float32, minval=-bound, maxval=bound)
    return params


def reference_forward(x, params):
    h = jnp.maximum(x @ params["w1"] + params["b1"], 0.0)
    h = jnp.maximum(h @ params["w2"] + params["b2"], 0.0)
    return h @ params["w3"] + params["b3"]


if __name__ == "__main__":
    key = jax.random.PRNGKey(0)
    kp, kx, kx2, kx3 = jax.random.split(key, 4)
    params = init_params(kp)
    slab = pack_params(params)

    # MountainCar observation = 2 floats (position, velocity); batch of 8.
    x = jax.random.normal(kx, (8, 2), jnp.float32)
    out = jax.block_until_ready(network_forward(x, slab))
    ref = reference_forward(x, params)
    assert out.shape == (8, 3), out.shape
    assert jnp.allclose(out, ref, atol=1e-5, rtol=1e-5), "mismatch vs. JAX reference (B=8)"

    # Exercise the batch-padding path (B not a multiple of 128).
    x2 = jax.random.normal(kx2, (100, 2), jnp.float32)
    out2 = jax.block_until_ready(network_forward(x2, slab))
    ref2 = reference_forward(x2, params)
    assert out2.shape == (100, 3), out2.shape
    assert jnp.allclose(out2, ref2, atol=1e-5, rtol=1e-5), "mismatch vs. JAX reference (B=100)"

    # Exercise the multi-block grid path with a small tile.
    x3 = jax.random.normal(kx3, (1000, 2), jnp.float32)
    out3 = jax.block_until_ready(network_forward(x3, slab, max_block_cols=256))
    ref3 = reference_forward(x3, params)
    assert out3.shape == (1000, 3), out3.shape
    assert jnp.allclose(out3, ref3, atol=1e-5, rtol=1e-5), "mismatch vs. JAX reference (B=1000)"

    print("KERNEL_OK")
</pallas_src>

<mosaic_0001>
module attributes {stable_mosaic.version = 11 : i64} {
  func.func @mlp_kernel(%arg0: i32, %arg1: memref<2x128xf32, #tpu.memory_space<vmem>>, %arg2: memref<80x16xf32, #tpu.memory_space<vmem>>, %arg3: memref<8x128xf32, #tpu.memory_space<vmem>>) attributes {dimension_semantics = [#tpu.dimension_semantics<parallel>], iteration_bounds = array<i64: 1>, scalar_prefetch = 0 : i64, scratch_operands = 0 : i64, tpu.core_type = #tpu.core_type<tc>, window_params = [{transform_indices = @transform_0, window_bounds = array<i64: 2, 128>}, {pipeline_mode = #tpu.pipeline_mode<synchronous>, transform_indices = @transform_1, window_bounds = array<i64: 80, 16>}, {transform_indices = @transform_2, window_bounds = array<i64: 8, 128>}]} {
    %c0 = arith.constant 0 : index
    %c0_0 = arith.constant 0 : index
    %0 = vector.load %arg1[%c0, %c0_0] : memref<2x128xf32, #tpu.memory_space<vmem>>, vector<2x128xf32>
    %c0_1 = arith.constant 0 : index
    %c0_2 = arith.constant 0 : index
    %1 = vector.load %arg2[%c0_1, %c0_2] : memref<80x16xf32, #tpu.memory_space<vmem>>, vector<16x2xf32>
    %c16 = arith.constant 16 : index
    %c0_3 = arith.constant 0 : index
    %2 = vector.load %arg2[%c16, %c0_3] : memref<80x16xf32, #tpu.memory_space<vmem>>, vector<16x1xf32>
    %3 = vector.extract_strided_slice %1 {offsets = [0, 0], sizes = [16, 1], strides = [1, 1]} : vector<16x2xf32> to vector<16x1xf32>
    %4 = vector.extract_strided_slice %0 {offsets = [0, 0], sizes = [1, 128], strides = [1, 1]} : vector<2x128xf32> to vector<1x128xf32>
    %5 = vector.broadcast %3 : vector<16x1xf32> to vector<16x128xf32>
    %6 = vector.broadcast %4 : vector<1x128xf32> to vector<16x128xf32>
    %7 = arith.mulf %5, %6 : vector<16x128xf32>
    %8 = vector.extract_strided_slice %1 {offsets = [0, 1], sizes = [16, 1], strides = [1, 1]} : vector<16x2xf32> to vector<16x1xf32>
    %9 = vector.extract_strided_slice %0 {offsets = [1, 0], sizes = [1, 128], strides = [1, 1]} : vector<2x128xf32> to vector<1x128xf32>
    %10 = vector.broadcast %8 : vector<16x1xf32> to vector<16x128xf32>
    %11 = vector.broadcast %9 : vector<1x128xf32> to vector<16x128xf32>
    %12 = arith.mulf %10, %11 : vector<16x128xf32>
    %13 = arith.addf %7, %12 : vector<16x128xf32>
    %14 = vector.broadcast %2 : vector<16x1xf32> to vector<16x128xf32>
    %15 = arith.addf %13, %14 : vector<16x128xf32>
    %cst = arith.constant 0.000000e+00 : f32
    %16 = vector.broadcast %cst : f32 to vector<16x128xf32>
    %17 = arith.maximumf %15, %16 : vector<16x128xf32>
    %c32 = arith.constant 32 : index
    %c0_4 = arith.constant 0 : index
    %18 = vector.load %arg2[%c32, %c0_4] : memref<80x16xf32, #tpu.memory_space<vmem>>, vector<16x16xf32>
    %c48 = arith.constant 48 : index
    %c0_5 = arith.constant 0 : index
    %19 = vector.load %arg2[%c48, %c0_5] : memref<80x16xf32, #tpu.memory_space<vmem>>, vector<16x1xf32>
    %cst_6 = arith.constant dense<0.000000e+00> : vector<16x128xf32>
    %20 = tpu.matmul %18, %17, %cst_6 {dimension_numbers = #tpu.dot_dimension_numbers<[1], [0], [0], [1], [0, 0, 1, 1], [], []>} : vector<16x16xf32>, vector<16x128xf32>, vector<16x128xf32> -> vector<16x128xf32>
    %21 = vector.broadcast %19 : vector<16x1xf32> to vector<16x128xf32>
    %22 = arith.addf %20, %21 : vector<16x128xf32>
    %cst_7 = arith.constant 0.000000e+00 : f32
    %23 = vector.broadcast %cst_7 : f32 to vector<16x128xf32>
    %24 = arith.maximumf %22, %23 : vector<16x128xf32>
    %c64 = arith.constant 64 : index
    %c0_8 = arith.constant 0 : index
    %25 = vector.load %arg2[%c64, %c0_8] : memref<80x16xf32, #tpu.memory_space<vmem>>, vector<8x16xf32>
    %c72 = arith.constant 72 : index
    %c0_9 = arith.constant 0 : index
    %26 = vector.load %arg2[%c72, %c0_9] : memref<80x16xf32, #tpu.memory_space<vmem>>, vector<8x1xf32>
    %cst_10 = arith.constant dense<0.000000e+00> : vector<8x128xf32>
    %27 = tpu.matmul %25, %24, %cst_10 {dimension_numbers = #tpu.dot_dimension_numbers<[1], [0], [0], [1], [0, 0, 1, 1], [], []>} : vector<8x16xf32>, vector<16x128xf32>, vector<8x128xf32> -> vector<8x128xf32>
    %28 = vector.broadcast %26 : vector<8x1xf32> to vector<8x128xf32>
    %29 = arith.addf %27, %28 : vector<8x128xf32>
    %c0_11 = arith.constant 0 : index
    %c0_12 = arith.constant 0 : index
    %30 = vector.load %arg3[%c0_11, %c0_12] : memref<8x128xf32, #tpu.memory_space<vmem>>, vector<8x128xf32>
    tpu.vector_store %arg3[%c0_11, %c0_12], %29 {strides = array<i32>} : memref<8x128xf32, #tpu.memory_space<vmem>>, vector<8x128xf32>,
    return
  }
  func.func @transform_0(%arg0: i32) -> (i32, i32) {
    %c0_i32 = arith.constant 0 : i32
    %c0_i32_0 = arith.constant 0 : i32
    return %c0_i32, %arg0 : i32, i32
  }
  func.func @transform_1(%arg0: i32) -> (i32, i32) {
    %c0_i32 = arith.constant 0 : i32
    %c0_i32_0 = arith.constant 0 : i32
    %c0_i32_1 = arith.constant 0 : i32
    return %c0_i32, %c0_i32_0 : i32, i32
  }
  func.func @transform_2(%arg0: i32) -> (i32, i32) {
    %c0_i32 = arith.constant 0 : i32
    %c0_i32_0 = arith.constant 0 : i32
    return %c0_i32, %arg0 : i32, i32
  }
}

</mosaic_0001>

<bundles_post_ra>
// kernel: tpu_custom_call.1
= control target key start
LH: loop header
LB: loop body
LE: loop exit
PB: predicated region body
PF: predicated region fallthrough
CT: control target
= control target key end

     0   :  { %v313_v2 = vmov 0   ;;  %s372_s0 = inlined_call_operand.vmem [shape: f32[2,128], index: 0, kind: input, shape index: {}]   ;;  %s373_s1 = inlined_call_operand.vmem [shape: f32[80,16], index: 1, kind: input, shape index: {}]   ;;  %s374_s2 = inlined_call_operand.hbm [shape: f32[8,128], index: 2, kind: output, shape index: {}]  }
   0x1   :  { %v14_v0 = vld [vmem:[%s373_s1 + $0x8] sm:$0xff]  ;;  %v13_v1 = vld [vmem:[%s373_s1] sm:$0xff]  ;;  %287 = vset.pattern.permute.xlu1 %v313_v2  ;;  %285 = vset.pattern.permute.xlu0 %v313_v2 }
   0x2   :  { %24 = vperm.xlu0 %285, %v14_v0   ;;  %19 = vperm.xlu1 %287, %v13_v1  }
   0x3   :  { %7 = vsyncpa [#allocation3], 0  ;;  %v314_v3 = vmov 1   ;;  %v15_v4 = vld [vmem:[%s373_s1 + $0x10] sm:$0xff]  ;;  %v16_v5 = vld [vmem:[%s373_s1 + $0x18] sm:$0xff]  ;;  %vm77_vm0 = vcmask 130048   ;;  %v27_v10 = vlaneseq }
   0x4   :  { %v162_v6 = vld [vmem:[%s373_s1 + $0x48] sm:$0xff]  ;;  %v66_v7 = vld [vmem:[%s373_s1 + $0x38] sm:$0xff]  ;;  %v63_v8 = vld [vmem:[%s373_s1 + $0x20] sm:$0xff]  ;;  %v315_v34 = vmov 0.0   ;;  %vm316_vm1 = vmmov 0   ;;  %s317_s30 = smov [#allocation2]  }
   0x5   :  { %270 = vmatprep.mubr.msk.f32.mxu0 %vm77_vm0, %v63_v8  ;;  %v65_v9 = vld [vmem:[%s373_s1 + $0x30] sm:$0xff]  ;;  %v28_v11 = vshrl.u32 %v27_v10, 7  ;;  %v12_v14 = vld [vmem:[%s372_s0] sm:$0x3]  ;;  %v64_v33 = vld [vmem:[%s373_s1 + $0x28] sm:$0xff]  ;;  %273 = vmatprep.subr.mxu1 %v315_v34  ;;  %s248_s3 = sshll.u32 %s317_s30, 4  ;;  %s249_s3 = int_to_ptr.vmem [resolvable:$true] %s248_s3 }
   0x6   :  { %286 = vset.pattern.permute.xlu0 %v314_v3  ;;  %288 = vset.pattern.permute.xlu1 %v314_v3  ;;  %v161_v43 = vld [vmem:[%s373_s1 + $0x40] sm:$0xff]  ;;  %s291_s4 = scalar_lea.vmem %s249_s3, 128  ;;  %p296_p1 = scmp.lt.s32.totalorder %s249_s3, %s249_s3 }
   0x7   :  { %38 = vperm.xlu0 %286, %v14_v0   ;;  %34 = vperm.xlu1 %288, %v13_v1   ;;  %v29_v12 = vsub.s32 0, %v28_v11  ;;  %v43_v13 = vsub.s32 1, %v28_v11  ;;  %p292_p0 = scmp.ne.s32.totalorder %s249_s3, %s291_s4  ;;  %p297_p2 = scmp.lt.s32.totalorder %s291_s4, %s291_s4 }
   0x8   :  { %277 = vmatprep.mubr.msk.f32.mxu1 %vm316_vm1, %v315_v34 }
   0x9   :  { %v30_v17 = vrot.slane %v12_v14, %v29_v12  ;;  %v44_v18 = vrot.slane %v12_v14, %v43_v13  ;;  %p298_p3 = por %p297_p2, %p296_p1 }
   0xb   :  { %290 = vset.pattern.permute.xlu0 %v313_v2  ;;  %289 = vset.pattern.permute.xlu1 %v313_v2  ;;  %p299_p4 = pnand %p298_p3, %p292_p0 }
   0xc   :  { %51 = vperm.xlu0 %290, %v15_v4   ;;  %56 = vperm.xlu1 %289, %v16_v5  }
  0x10   :  { %165 = vperm.xlu0 %290, %v162_v6   ;;  %74 = vperm.xlu1 %289, %v66_v7  }
  0x14   :  { %69 = vperm.xlu1 %289, %v65_v9  }
  0x7d   :  { %v20_v15 = vpop.permute.xlu1 %19  ;;  %v25_v16 = vpop.permute.xlu0 %24 }
  0x7e   :  { %v31_v21 = vmul.f32 %v30_v17, %v20_v15  ;;  %v32_v22 = vmul.f32 %v30_v17, %v25_v16 }
  0x82   :  { %v39_v19 = vpop.permute.xlu0 %38  ;;  %v35_v20 = vpop.permute.xlu1 %34 }
  0x83   :  { %v46_v23 = vmul.f32 %v44_v18, %v39_v19  ;;  %v45_v24 = vmul.f32 %v44_v18, %v35_v20 }
  0x85   :  { %v47_v25 = vadd.f32 %v45_v24, %v31_v21  ;;  %v48_v26 = vadd.f32 %v46_v23, %v32_v22 }
  0x87   :  { %v52_v27 = vpop.permute.xlu0 %51  ;;  %v57_v28 = vpop.permute.xlu1 %56 }
  0x88   :  { %v59_v29 = vadd.f32 %v52_v27, %v47_v25  ;;  %v60_v30 = vadd.f32 %v57_v28, %v48_v26 }
  0x8a   :  { %v62_v31 = vmax.f32 %v60_v30, 0.0  ;;  %v61_v32 = vmax.f32 %v59_v29, 0.0 }
  0x8b   :  { %v75_v35 = vpop.permute.xlu1 %74  ;;  %v166_v44 = vpop.permute.xlu0 %165 }
  0x8c   :  { %266 = vmatprep.subr.mxu0 %v62_v31 }
  0x8d   :  { %267 = vmatpush3.msra.mxu0 %v62_v31 }
  0x8e   :  { %268 = vmatprep.subr.mxu0 %v61_v32 }
  0x8f   :  { %269 = vmatpush3.msra.mxu0 %v61_v32  ;;  %v70_v38 = vpop.permute.xlu1 %69 }
  0x90   :  { %271 = vmatmul.mubr.msk.f32.vlgmr.msra.gmra.mxu0 %vm77_vm0, %v64_v33 }
 0x150   :  { %v272_v36 = vpop.f32.mrf.mxu0 }
 0x151   :  { %v156_v37 = vadd.f32 %v272_v36, %v75_v35 }
 0x152   :  { %v150_v39 = vpop.f32.mrf.mxu0 }
 0x153   :  { %v160_v40 = vmax.f32 %v156_v37, 0.0  ;;  %v151_v41 = vadd.f32 %v150_v39, %v70_v38 }
 0x155   :  { %v159_v42 = vmax.f32 %v151_v41, 0.0  ;;  %274 = vmatpush3.msra.mxu1 %v160_v40 }
 0x156   :  { %275 = vmatprep.subr.mxu1 %v315_v34 }
 0x157   :  { %276 = vmatpush3.msra.mxu1 %v159_v42 }
 0x158   :  { %278 = vmatmul.mubr.msk.f32.vlgmr.msra.gmra.mxu1 %vm77_vm0, %v161_v43 }
 0x218   :  { %v237_v45 = vpop.f32.mrf.mxu1 }
 0x219   :  { %v238_v46 = vadd.f32 %v237_v45, %v166_v44 }
 0x21a   :  { %v279_v47 = vpop.f32.mrf.mxu1 }
 0x21b   :  { %241 = vst [vmem:[#allocation2] sm:$0xff] %v238_v46 }
 0x21c   :  { %302 = shalt.err (!%p299_p4)
}
 0x21d   :  { %251 = dma.vmem_to_hbm [thread:$0]  %s249_s3, 128, %s374_s2, [#allocation3]  }
 0x21e   :  { %311 = dma.done.wait [#allocation3], 128  }
 0x21f   :  { %312 = vsyncadd [#allocation3], 4294967168 }
 0x220   :  { %255 = vsyncpa [#allocation3], 1 }

</bundles_post_ra>
